<compile_context>
chip_gen: v7x
topology: tpu7x:2x2x1
jax: 0.10.0
libtpu: 0.0.40
codegen_flags: <defaults>
</compile_context>

<pallas_src>
import math

import jax
import jax.numpy as jnp
from jax.experimental import pallas as pl
from jax.experimental.pallas import tpu as pltpu


# ----------------------------- kernels ------------------------------------


def _noisy_linear_kernel(x_ref, muw_ref, sigw_ref, mub_ref, sigb_ref,
                         eps_in_ref, eps_out_col_ref, eps_out_row_ref,
                         o_ref, w_sc, b_sc):
    # Build effective weight/bias for this O tile once (first batch tile);
    # the VMEM scratch persists across the inner (batch) grid axis.
    @pl.when(pl.program_id(1) == 0)
    def _build():
        noise_w = eps_out_col_ref[...] * eps_in_ref[...]           # (ot,1)*(1,F) -> (ot,F)
        w_sc[...] = muw_ref[...] + sigw_ref[...] * noise_w         # (ot, F)
        b_sc[...] = mub_ref[...] + sigb_ref[...] * eps_out_row_ref[...]  # (1, ot)

    # y = x @ W^T without any transpose (MXU handles the trans_b contraction).
    y = jax.lax.dot_general(
        x_ref[...], w_sc[...],
        dimension_numbers=(((1,), (1,)), ((), ())),
        preferred_element_type=jnp.float32)
    o_ref[...] = (y + b_sc[...]).astype(o_ref.dtype)


def _linear_kernel(x_ref, w_ref, b_ref, o_ref):
    # Fast eval path: plain linear, no sigma/noise work at all.
    y = jax.lax.dot_general(
        x_ref[...], w_ref[...],
        dimension_numbers=(((1,), (1,)), ((), ())),
        preferred_element_type=jnp.float32)
    o_ref[...] = (y + b_ref[...]).astype(o_ref.dtype)


# ----------------------------- tiling helpers ------------------------------


def _round_up(n, m):
    return ((n + m - 1) // m) * m


def _pad2(a, rows, cols):
    pr, pc = rows - a.shape[0], cols - a.shape[1]
    if pr or pc:
        a = jnp.pad(a, ((0, pr), (0, pc)))
    return a


_VMEM_BUDGET = 48 * 1024 * 1024   # headroom below v7x's 64 MiB physical VMEM
_VMEM_LIMIT = 64 * 1024 * 1024    # raise scoped limit above 16/32 MiB defaults


def _choose_o_tile(o_pad, f_pad, bm):
    def est(ot):
        return 4 * (2 * bm * f_pad      # x block, double buffered
                    + 4 * ot * f_pad    # mu_w + sigma_w blocks, double buffered
                    + 2 * bm * ot       # out block, double buffered
                    + ot * f_pad)       # effective-weight scratch (single)
    for ot in (512, 256, 128):
        if ot <= o_pad and o_pad % ot == 0 and est(ot) <= _VMEM_BUDGET:
            return ot
    # TODO(synk): tile the F (reduction) axis with an f32 accumulator scratch
    # when even a 128-wide O tile exceeds the VMEM budget (huge in_features).
    return 128


def _tiling(B, F, O):
    F_pad = _round_up(F, 128)
    O_pad = _round_up(O, 128)
    bm = min(256, _round_up(B, 8))
    B_pad = _round_up(B, bm)
    ot = _choose_o_tile(O_pad, F_pad, bm)
    return B_pad, F_pad, O_pad, bm, ot


# ----------------------------- wrappers -------------------------------------


def noisy_linear_pallas(x, mu_w, sigma_w, mu_b, sigma_b, eps_in, eps_out):
    """Training forward: x (..., F) -> (..., O) with fused noisy weights."""
    F = x.shape[-1]
    O = mu_w.shape[0]
    lead = x.shape[:-1]
    x2 = x.reshape(-1, F)
    B = x2.shape[0]

    B_pad, F_pad, O_pad, bm, ot = _tiling(B, F, O)
    grid = (O_pad // ot, B_pad // bm)

    xp = _pad2(x2, B_pad, F_pad)
    muw = _pad2(mu_w, O_pad, F_pad)
    sigw = _pad2(sigma_w, O_pad, F_pad)
    mub = _pad2(mu_b.reshape(1, O), 1, O_pad)
    sigb = _pad2(sigma_b.reshape(1, O), 1, O_pad)
    e_in = _pad2(eps_in.reshape(1, F), 1, F_pad)
    e_out_col = _pad2(eps_out.reshape(O, 1), O_pad, 1)
    e_out_row = _pad2(eps_out.reshape(1, O), 1, O_pad)

    out = pl.pallas_call(
        _noisy_linear_kernel,
        out_shape=jax.ShapeDtypeStruct((B_pad, O_pad), x.dtype),
        grid=grid,
        in_specs=[
            pl.BlockSpec((bm, F_pad), lambda oi, bi: (bi, 0)),   # x
            pl.BlockSpec((ot, F_pad), lambda oi, bi: (oi, 0)),   # mu_weight
            pl.BlockSpec((ot, F_pad), lambda oi, bi: (oi, 0)),   # sigma_weight
            pl.BlockSpec((1, ot), lambda oi, bi: (0, oi)),       # mu_bias
            pl.BlockSpec((1, ot), lambda oi, bi: (0, oi)),       # sigma_bias
            pl.BlockSpec((1, F_pad), lambda oi, bi: (0, 0)),     # eps_in (row)
            pl.BlockSpec((ot, 1), lambda oi, bi: (oi, 0)),       # eps_out (col)
            pl.BlockSpec((1, ot), lambda oi, bi: (0, oi)),       # eps_out (row)
        ],
        out_specs=pl.BlockSpec((bm, ot), lambda oi, bi: (bi, oi)),
        scratch_shapes=[
            pltpu.VMEM((ot, F_pad), jnp.float32),   # effective weight
            pltpu.VMEM((1, ot), jnp.float32),       # effective bias
        ],
        compiler_params=pltpu.CompilerParams(
            dimension_semantics=("parallel", "arbitrary"),
            vmem_limit_bytes=_VMEM_LIMIT),
    )(xp, muw, sigw, mub, sigb, e_in, e_out_col, e_out_row)

    return out[:B, :O].reshape(*lead, O)


def linear_pallas(x, w, b):
    """Eval forward: y = x @ w^T + b (no noise math)."""
    F = x.shape[-1]
    O = w.shape[0]
    lead = x.shape[:-1]
    x2 = x.reshape(-1, F)
    B = x2.shape[0]

    B_pad, F_pad, O_pad, bm, ot = _tiling(B, F, O)
    grid = (O_pad // ot, B_pad // bm)

    xp = _pad2(x2, B_pad, F_pad)
    wp = _pad2(w, O_pad, F_pad)
    bp = _pad2(b.reshape(1, O), 1, O_pad)

    out = pl.pallas_call(
        _linear_kernel,
        out_shape=jax.ShapeDtypeStruct((B_pad, O_pad), x.dtype),
        grid=grid,
        in_specs=[
            pl.BlockSpec((bm, F_pad), lambda oi, bi: (bi, 0)),
            pl.BlockSpec((ot, F_pad), lambda oi, bi: (oi, 0)),
            pl.BlockSpec((1, ot), lambda oi, bi: (0, oi)),
        ],
        out_specs=pl.BlockSpec((bm, ot), lambda oi, bi: (bi, oi)),
        compiler_params=pltpu.CompilerParams(
            dimension_semantics=("parallel", "parallel"),
            vmem_limit_bytes=_VMEM_LIMIT),
    )(xp, wp, bp)

    return out[:B, :O].reshape(*lead, O)


# ---------------------------------------------------------------------------
# Parameter / noise setup (plain JAX glue mirroring parameter_initialization
# and sample_noise of the factorised NoisyNet layer).
# ---------------------------------------------------------------------------


def _noise_transform(u):
    # get_noise_tensor: sign(u) * sqrt(|u|)
    return jnp.sign(u) * jnp.sqrt(jnp.abs(u))


def init_params(key, in_features, out_features, sigma=0.5):
    bound = 1.0 / math.sqrt(in_features)
    k1, k2 = jax.random.split(key)
    mu_w = jax.random.uniform(k1, (out_features, in_features),
                              minval=-bound, maxval=bound, dtype=jnp.float32)
    mu_b = jax.random.uniform(k2, (out_features,),
                              minval=-bound, maxval=bound, dtype=jnp.float32)
    sigma_w = jnp.full((out_features, in_features),
                       sigma / math.sqrt(in_features), dtype=jnp.float32)
    sigma_b = jnp.full((out_features,),
                       sigma / math.sqrt(in_features), dtype=jnp.float32)
    return dict(mu_w=mu_w, sigma_w=sigma_w, mu_b=mu_b, sigma_b=sigma_b, bound=bound)


def sample_noise(key, in_features, out_features, bound):
    k1, k2 = jax.random.split(key)
    u_in = jax.random.uniform(k1, (in_features,), minval=-bound, maxval=bound,
                              dtype=jnp.float32)
    u_out = jax.random.uniform(k2, (out_features,), minval=-bound, maxval=bound,
                               dtype=jnp.float32)
    return _noise_transform(u_in), _noise_transform(u_out)


def noisy_layer_forward(params, x, *, training=True, sample_noise_flag=True,
                        noise_key=None):
    if not training:
        # Fast eval path: pure mu linear, no sigma reads / noise math.
        return linear_pallas(x, params["mu_w"], params["mu_b"])
    F = x.shape[-1]
    O = params["mu_w"].shape[0]
    if sample_noise_flag:
        assert noise_key is not None
        eps_in, eps_out = sample_noise(noise_key, F, O, params["bound"])
    else:
        # TODO(synk): persistent epsilon state between calls (sample_noise=False
        # reuses last sampled noise); here we just resample with a fixed key.
        eps_in, eps_out = sample_noise(jax.random.PRNGKey(1), F, O, params["bound"])
    return noisy_linear_pallas(x, params["mu_w"], params["sigma_w"],
                               params["mu_b"], params["sigma_b"],
                               eps_in, eps_out)


if __name__ == "__main__":
    key = jax.random.PRNGKey(0)
    k_x, k_p, k_n = jax.random.split(key, 3)

    batch, in_features, out_features = 8, 32, 16
    sigma = 0.5

    x = jax.random.normal(k_x, (batch, in_features), dtype=jnp.float32)
    params = init_params(k_p, in_features, out_features, sigma=sigma)

    # Training-mode forward (noisy weights) via the fused Pallas kernel.
    y_train = noisy_layer_forward(params, x, training=True, noise_key=k_n)
    y_train = jax.block_until_ready(y_train)

    # Eval-mode forward (pure mu weights) via the plain-linear kernel.
    y_eval = noisy_layer_forward(params, x, training=False)
    y_eval = jax.block_until_ready(y_eval)

    # Reference check against plain JAX (torch.nn.functional.linear semantics).
    eps_in, eps_out = sample_noise(k_n, in_features, out_features, params["bound"])
    w_eff = params["mu_w"] + params["sigma_w"] * jnp.outer(eps_out, eps_in)
    b_eff = params["mu_b"] + params["sigma_b"] * eps_out
    ref_train = x @ w_eff.T + b_eff
    ref_eval = x @ params["mu_w"].T + params["mu_b"]

    assert y_train.shape == (batch, out_features)
    assert y_eval.shape == (batch, out_features)
    assert jnp.allclose(y_train, ref_train, atol=1e-5, rtol=1e-5)
    assert jnp.allclose(y_eval, ref_eval, atol=1e-5, rtol=1e-5)

    print("KERNEL_OK")
</pallas_src>

<mosaic_0001>
module attributes {stable_mosaic.version = 11 : i64} {
  func.func @_noisy_linear_kernel(%arg0: i32, %arg1: i32, %arg2: memref<8x128xf32, #tpu.memory_space<vmem>>, %arg3: memref<128x128xf32, #tpu.memory_space<vmem>>, %arg4: memref<128x128xf32, #tpu.memory_space<vmem>>, %arg5: memref<1x128xf32, #tpu.memory_space<vmem>>, %arg6: memref<1x128xf32, #tpu.memory_space<vmem>>, %arg7: memref<1x128xf32, #tpu.memory_space<vmem>>, %arg8: memref<128x1xf32, #tpu.memory_space<vmem>>, %arg9: memref<1x128xf32, #tpu.memory_space<vmem>>, %arg10: memref<8x128xf32, #tpu.memory_space<vmem>>, %arg11: memref<128x128xf32, #tpu.memory_space<vmem>>, %arg12: memref<1x128xf32, #tpu.memory_space<vmem>>) attributes {dimension_semantics = [#tpu.dimension_semantics<parallel>, #tpu.dimension_semantics<arbitrary>], iteration_bounds = array<i64: 1, 1>, scalar_prefetch = 0 : i64, scratch_operands = 2 : i64, tpu.core_type = #tpu.core_type<tc>, window_params = [{transform_indices = @transform_0, window_bounds = array<i64: 8, 128>}, {transform_indices = @transform_1, window_bounds = array<i64: 128, 128>}, {transform_indices = @transform_2, window_bounds = array<i64: 128, 128>}, {transform_indices = @transform_3, window_bounds = array<i64: 1, 128>}, {transform_indices = @transform_4, window_bounds = array<i64: 1, 128>}, {pipeline_mode = #tpu.pipeline_mode<synchronous>, transform_indices = @transform_5, window_bounds = array<i64: 1, 128>}, {transform_indices = @transform_6, window_bounds = array<i64: 128, 1>}, {transform_indices = @transform_7, window_bounds = array<i64: 1, 128>}, {transform_indices = @transform_8, window_bounds = array<i64: 8, 128>}]} {
    %c0_i32 = arith.constant 0 : i32
    %0 = arith.cmpi eq, %arg1, %c0_i32 : i32
    %1 = arith.extui %0 : i1 to i32
    %c0_i32_0 = arith.constant 0 : i32
    %2 = arith.cmpi ne, %1, %c0_i32_0 : i32
    scf.if %2 {
      %c0_8 = arith.constant 0 : index
      %c0_9 = arith.constant 0 : index
      %10 = vector.load %arg8[%c0_8, %c0_9] : memref<128x1xf32, #tpu.memory_space<vmem>>, vector<128x1xf32>
      %c0_10 = arith.constant 0 : index
      %c0_11 = arith.constant 0 : index
      %11 = vector.load %arg7[%c0_10, %c0_11] : memref<1x128xf32, #tpu.memory_space<vmem>>, vector<1x128xf32>
      %12 = vector.broadcast %10 : vector<128x1xf32> to vector<128x128xf32>
      %13 = vector.broadcast %11 : vector<1x128xf32> to vector<128x128xf32>
      %14 = arith.mulf %12, %13 : vector<128x128xf32>
      %c0_12 = arith.constant 0 : index
      %c0_13 = arith.constant 0 : index
      %15 = vector.load %arg3[%c0_12, %c0_13] : memref<128x128xf32, #tpu.memory_space<vmem>>, vector<128x128xf32>
      %c0_14 = arith.constant 0 : index
      %c0_15 = arith.constant 0 : index
      %16 = vector.load %arg4[%c0_14, %c0_15] : memref<128x128xf32, #tpu.memory_space<vmem>>, vector<128x128xf32>
      %17 = arith.mulf %16, %14 : vector<128x128xf32>
      %18 = arith.addf %15, %17 : vector<128x128xf32>
      %c0_16 = arith.constant 0 : index
      %c0_17 = arith.constant 0 : index
      %19 = vector.load %arg11[%c0_16, %c0_17] : memref<128x128xf32, #tpu.memory_space<vmem>>, vector<128x128xf32>
      tpu.vector_store %arg11[%c0_16, %c0_17], %18 {strides = array<i32>} : memref<128x128xf32, #tpu.memory_space<vmem>>, vector<128x128xf32>,
      %c0_18 = arith.constant 0 : index
      %c0_19 = arith.constant 0 : index
      %20 = vector.load %arg5[%c0_18, %c0_19] : memref<1x128xf32, #tpu.memory_space<vmem>>, vector<1x128xf32>
      %c0_20 = arith.constant 0 : index
      %c0_21 = arith.constant 0 : index
      %21 = vector.load %arg6[%c0_20, %c0_21] : memref<1x128xf32, #tpu.memory_space<vmem>>, vector<1x128xf32>
      %c0_22 = arith.constant 0 : index
      %c0_23 = arith.constant 0 : index
      %22 = vector.load %arg9[%c0_22, %c0_23] : memref<1x128xf32, #tpu.memory_space<vmem>>, vector<1x128xf32>
      %23 = arith.mulf %21, %22 : vector<1x128xf32>
      %24 = arith.addf %20, %23 : vector<1x128xf32>
      %c0_24 = arith.constant 0 : index
      %c0_25 = arith.constant 0 : index
      %25 = vector.load %arg12[%c0_24, %c0_25] : memref<1x128xf32, #tpu.memory_space<vmem>>, vector<1x128xf32>
      tpu.vector_store %arg12[%c0_24, %c0_25], %24 {strides = array<i32>} : memref<1x128xf32, #tpu.memory_space<vmem>>, vector<1x128xf32>,
    } else {
    }
    %c0 = arith.constant 0 : index
    %c0_1 = arith.constant 0 : index
    %3 = vector.load %arg2[%c0, %c0_1] : memref<8x128xf32, #tpu.memory_space<vmem>>, vector<8x128xf32>
    %c0_2 = arith.constant 0 : index
    %c0_3 = arith.constant 0 : index
    %4 = vector.load %arg11[%c0_2, %c0_3] : memref<128x128xf32, #tpu.memory_space<vmem>>, vector<128x128xf32>
    %cst = arith.constant dense<0.000000e+00> : vector<8x128xf32>
    %5 = tpu.matmul %3, %4, %cst {dimension_numbers = #tpu.dot_dimension_numbers<[1], [1], [0], [0], [0, 0, 1, 0], [], []>} : vector<8x128xf32>, vector<128x128xf32>, vector<8x128xf32> -> vector<8x128xf32>
    %c0_4 = arith.constant 0 : index
    %c0_5 = arith.constant 0 : index
    %6 = vector.load %arg12[%c0_4, %c0_5] : memref<1x128xf32, #tpu.memory_space<vmem>>, vector<1x128xf32>
    %7 = vector.broadcast %6 : vector<1x128xf32> to vector<8x128xf32>
    %8 = arith.addf %5, %7 : vector<8x128xf32>
    %c0_6 = arith.constant 0 : index
    %c0_7 = arith.constant 0 : index
    %9 = vector.load %arg10[%c0_6, %c0_7] : memref<8x128xf32, #tpu.memory_space<vmem>>, vector<8x128xf32>
    tpu.vector_store %arg10[%c0_6, %c0_7], %8 {strides = array<i32>} : memref<8x128xf32, #tpu.memory_space<vmem>>, vector<8x128xf32>,
    return
  }
  func.func @transform_0(%arg0: i32, %arg1: i32) -> (i32, i32) {
    %c0_i32 = arith.constant 0 : i32
    %c0_i32_0 = arith.constant 0 : i32
    return %arg1, %c0_i32 : i32, i32
  }
  func.func @transform_1(%arg0: i32, %arg1: i32) -> (i32, i32) {
    %c0_i32 = arith.constant 0 : i32
    %c0_i32_0 = arith.constant 0 : i32
    return %arg0, %c0_i32 : i32, i32
  }
  func.func @transform_2(%arg0: i32, %arg1: i32) -> (i32, i32) {
    %c0_i32 = arith.constant 0 : i32
    %c0_i32_0 = arith.constant 0 : i32
    return %arg0, %c0_i32 : i32, i32
  }
  func.func @transform_3(%arg0: i32, %arg1: i32) -> (i32, i32) {
    %c0_i32 = arith.constant 0 : i32
    %c0_i32_0 = arith.constant 0 : i32
    return %c0_i32, %arg0 : i32, i32
  }
  func.func @transform_4(%arg0: i32, %arg1: i32) -> (i32, i32) {
    %c0_i32 = arith.constant 0 : i32
    %c0_i32_0 = arith.constant 0 : i32
    return %c0_i32, %arg0 : i32, i32
  }
  func.func @transform_5(%arg0: i32, %arg1: i32) -> (i32, i32) {
    %c0_i32 = arith.constant 0 : i32
    %c0_i32_0 = arith.constant 0 : i32
    %c0_i32_1 = arith.constant 0 : i32
    return %c0_i32, %c0_i32_0 : i32, i32
  }
  func.func @transform_6(%arg0: i32, %arg1: i32) -> (i32, i32) {
    %c0_i32 = arith.constant 0 : i32
    %c0_i32_0 = arith.constant 0 : i32
    return %arg0, %c0_i32 : i32, i32
  }
  func.func @transform_7(%arg0: i32, %arg1: i32) -> (i32, i32) {
    %c0_i32 = arith.constant 0 : i32
    %c0_i32_0 = arith.constant 0 : i32
    return %c0_i32, %arg0 : i32, i32
  }
  func.func @transform_8(%arg0: i32, %arg1: i32) -> (i32, i32) {
    %c0_i32 = arith.constant 0 : i32
    return %arg1, %arg0 : i32, i32
  }
}

</mosaic_0001>

<bundles_post_ra>
// kernel: tpu_custom_call.1
= control target key start
LH: loop header
LB: loop body
LE: loop exit
PB: predicated region body
PF: predicated region fallthrough
CT: control target
= control target key end

     0   :  { %13 = vsyncpa [#allocation5], 0  ;;  %s960_s0 = inlined_call_operand.hbm [shape: f32[8,128], index: 0, kind: input, shape index: {}]   ;;  %s961_s1 = inlined_call_operand.hbm [shape: f32[128,128], index: 1, kind: input, shape index: {}]   ;;  %s962_s2 = inlined_call_operand.hbm [shape: f32[128,128], index: 2, kind: input, shape index: {}]   ;;  %s963_s3 = inlined_call_operand.hbm [shape: f32[1,128], index: 3, kind: input, shape index: {}]   ;;  %s964_s4 = inlined_call_operand.hbm [shape: f32[1,128], index: 4, kind: input, shape index: {}]   ;;  %s965_s5 = inlined_call_operand.hbm [shape: f32[1,128], index: 5, kind: input, shape index: {}]   ;;  %s966_s6 = inlined_call_operand.hbm [shape: f32[128,1], index: 6, kind: input, shape index: {}]   ;;  %s967_s7 = inlined_call_operand.hbm [shape: f32[1,128], index: 7, kind: input, shape index: {}]   ;;  %s968_s8 = inlined_call_operand.hbm [shape: f32[8,128], index: 8, kind: output, shape index: {}]  }
   0x1   :  { %14 = vsyncpa [#allocation8], 0 }
   0x2   :  { %15 = vsyncpa [#allocation11], 0 }
   0x3   :  { %16 = vsyncpa [#allocation14], 0 }
   0x4   :  { %17 = vsyncpa [#allocation17], 0 }
   0x5   :  { %18 = vsyncpa [#allocation6], 0  ;;  %s757_s27 = smov [#allocation7]   ;;  %s547_s9 = scalar_lea.hbm %s961_s1, 2048 }
   0x6   :  { %s34_s28 = sshll.u32 %s757_s27, 4  ;;  %p548_p0 = scmp.ne.s32.totalorder %s961_s1, %s547_s9  ;;  %s35_s28 = int_to_ptr.vmem [resolvable:$true] %s34_s28 }
   0x7   :  { %p551_p1 = scmp.lt.u32.totalorder %s547_s9, %s961_s1 }
   0x9   :  { %p553_p2 = pnand %p551_p1, %p548_p0 }
   0xb   :  { %556 = shalt.err (!%p553_p2)
}
   0xc   :  { %s557_s14 = scalar_lea.vmem %s35_s28, 2048  ;;  %p562_p4 = scmp.lt.s32.totalorder %s35_s28, %s35_s28 }
   0xd   :  { %p558_p3 = scmp.ne.s32.totalorder %s35_s28, %s557_s14  ;;  %p563_p5 = scmp.lt.s32.totalorder %s557_s14, %s557_s14 }
   0xf   :  { %p564_p6 = por %p563_p5, %p562_p4 }
  0x11   :  { %p565_p7 = pnand %p564_p6, %p558_p3 }
  0x13   :  { %568 = shalt.err (!%p565_p7)
}
  0x14   :  { %s758_s15 = smov 128   ;;  %s759_s16 = smov 8  }
  0x15   :  { %40 = dma.hbm_to_vmem [thread:$0]  %s961_s1, 2048, %s35_s28, [#allocation8], %s758_s15, %s758_s15, %s759_s16  }
  0x16   :  { %s760_s19 = smov [#allocation10]   ;;  %s761_s21 = smov [#allocation13]  }
  0x17   :  { %s59_s20 = sshll.u32 %s760_s19, 4  ;;  %s79_s22 = sshll.u32 %s761_s21, 4  ;;  %s60_s20 = int_to_ptr.vmem [resolvable:$true] %s59_s20  ;;  %s80_s22 = int_to_ptr.vmem [resolvable:$true] %s79_s22 }
  0x18   :  { %s569_s25 = scalar_lea.hbm %s963_s3, 16 }
  0x19   :  { %p570_p8 = scmp.ne.s32.totalorder %s963_s3, %s569_s25  ;;  %p573_p9 = scmp.lt.u32.totalorder %s569_s25, %s963_s3 }
  0x1b   :  { %p575_p10 = pnand %p573_p9, %p570_p8 }
  0x1d   :  { %578 = shalt.err (!%p575_p10)
}
  0x1e   :  { %s579_s1 = scalar_lea.vmem %s60_s20, 16  ;;  %s583_s28 = scalar_lea.vmem %s60_s20, 32 }
  0x1f   :  { %p580_p11 = scmp.ne.s32.totalorder %s60_s20, %s579_s1  ;;  %p584_p12 = scmp.lt.s32.totalorder %s60_s20, %s60_s20 }
  0x20   :  { %p585_p13 = scmp.lt.s32.totalorder %s583_s28, %s579_s1 }
  0x22   :  { %p586_p0 = por %p585_p13, %p584_p12 }
  0x24   :  { %p587_p1 = pnand %p586_p0, %p580_p11 }
  0x26   :  { %590 = shalt.err (!%p587_p1)
}
  0x27   :  { %62 = dma.hbm_to_vmem [thread:$0]  %s963_s3, 16, %s60_s20, [#allocation11]  }
  0x28   :  { %s591_s13 = scalar_lea.hbm %s965_s5, 16 }
  0x29   :  { %p592_p2 = scmp.ne.s32.totalorder %s965_s5, %s591_s13  ;;  %p595_p3 = scmp.lt.u32.totalorder %s591_s13, %s965_s5 }
  0x2b   :  { %p597_p4 = pnand %p595_p3, %p592_p2 }
  0x2d   :  { %600 = shalt.err (!%p597_p4)
}
  0x2e   :  { %s601_s21 = scalar_lea.vmem %s80_s22, 16  ;;  %s605_s23 = scalar_lea.vmem %s80_s22, 32 }
  0x2f   :  { %p602_p5 = scmp.ne.s32.totalorder %s80_s22, %s601_s21  ;;  %p606_p6 = scmp.lt.s32.totalorder %s80_s22, %s80_s22 }
  0x30   :  { %p607_p7 = scmp.lt.s32.totalorder %s605_s23, %s601_s21 }
  0x32   :  { %p608_p8 = por %p607_p7, %p606_p6 }
  0x34   :  { %p609_p9 = pnand %p608_p8, %p602_p5 }
  0x36   :  { %612 = shalt.err (!%p609_p9)
}
  0x37   :  { %82 = dma.hbm_to_vmem [thread:$0]  %s965_s5, 16, %s80_s22, [#allocation14]  }
  0x38   :  { %s762_s24 = smov [#allocation4]   ;;  %s763_s26 = smov [#allocation9]  }
  0x39   :  { %s25_s25 = sshll.u32 %s762_s24, 4  ;;  %s46_s27 = sshll.u32 %s763_s26, 4  ;;  %s26_s25 = int_to_ptr.vmem [resolvable:$true] %s25_s25  ;;  %s47_s27 = int_to_ptr.vmem [resolvable:$true] %s46_s27 }
  0x3a   :  { %s613_s1 = scalar_lea.hbm %s960_s0, 128 }
  0x3b   :  { %p614_p10 = scmp.ne.s32.totalorder %s960_s0, %s613_s1  ;;  %p617_p11 = scmp.lt.u32.totalorder %s613_s1, %s960_s0 }
  0x3d   :  { %p619_p12 = pnand %p617_p11, %p614_p10 }
  0x3f   :  { %622 = shalt.err (!%p619_p12)
}
  0x40   :  { %s623_s5 = scalar_lea.vmem %s26_s25, 128  ;;  %p628_p0 = scmp.lt.s32.totalorder %s26_s25, %s26_s25 }
  0x41   :  { %p624_p13 = scmp.ne.s32.totalorder %s26_s25, %s623_s5  ;;  %p629_p1 = scmp.lt.s32.totalorder %s623_s5, %s623_s5 }
  0x43   :  { %p630_p2 = por %p629_p1, %p628_p0 }
  0x45   :  { %p631_p3 = pnand %p630_p2, %p624_p13 }
  0x47   :  { %634 = shalt.err (!%p631_p3)
}
  0x48   :  { %28 = dma.hbm_to_vmem [thread:$0]  %s960_s0, 128, %s26_s25, [#allocation5]  }
  0x49   :  { %s635_s17 = scalar_lea.hbm %s962_s2, 2048 }
  0x4a   :  { %p636_p4 = scmp.ne.s32.totalorder %s962_s2, %s635_s17  ;;  %p639_p5 = scmp.lt.u32.totalorder %s635_s17, %s962_s2 }
  0x4c   :  { %p641_p6 = pnand %p639_p5, %p636_p4 }
  0x4e   :  { %644 = shalt.err (!%p641_p6)
}
  0x4f   :  { %s645_s3 = scalar_lea.vmem %s47_s27, 2048  ;;  %p650_p8 = scmp.lt.s32.totalorder %s47_s27, %s47_s27 }
  0x50   :  { %p646_p7 = scmp.ne.s32.totalorder %s47_s27, %s645_s3  ;;  %p651_p9 = scmp.lt.s32.totalorder %s645_s3, %s645_s3 }
  0x52   :  { %p652_p10 = por %p651_p9, %p650_p8 }
  0x54   :  { %p653_p11 = pnand %p652_p10, %p646_p7 }
  0x56   :  { %656 = shalt.err (!%p653_p11)
}
  0x57   :  { %52 = dma.hbm_to_vmem [thread:$0]  %s962_s2, 2048, %s47_s27, [#allocation8], %s758_s15, %s758_s15, %s759_s16  }
  0x58   :  { %s764_s24 = smov [#allocation12]   ;;  %s765_s26 = smov [#allocation15]  }
  0x59   :  { %s69_s25 = sshll.u32 %s764_s24, 4  ;;  %s88_s29 = sshll.u32 %s765_s26, 4  ;;  %s70_s25 = int_to_ptr.vmem [resolvable:$true] %s69_s25  ;;  %s89_s29 = int_to_ptr.vmem [resolvable:$true] %s88_s29 }
  0x5a   :  { %s657_s28 = scalar_lea.hbm %s964_s4, 16 }
  0x5b   :  { %p658_p12 = scmp.ne.s32.totalorder %s964_s4, %s657_s28  ;;  %p661_p13 = scmp.lt.u32.totalorder %s657_s28, %s964_s4 }
  0x5d   :  { %p663_p0 = pnand %p661_p13, %p658_p12 }
  0x5f   :  { %666 = shalt.err (!%p663_p0)
}
  0x60   :  { %s667_s2 = scalar_lea.vmem %s70_s25, 16  ;;  %s671_s27 = scalar_lea.vmem %s70_s25, 32 }
  0x61   :  { %p668_p1 = scmp.ne.s32.totalorder %s70_s25, %s667_s2  ;;  %p672_p2 = scmp.lt.s32.totalorder %s70_s25, %s70_s25 }
  0x62   :  { %p673_p3 = scmp.lt.s32.totalorder %s671_s27, %s667_s2 }
  0x64   :  { %p674_p4 = por %p673_p3, %p672_p2 }
  0x66   :  { %p675_p5 = pnand %p674_p4, %p668_p1 }
  0x68   :  { %678 = shalt.err (!%p675_p5)
}
  0x69   :  { %72 = dma.hbm_to_vmem [thread:$0]  %s964_s4, 16, %s70_s25, [#allocation11]  }
  0x6a   :  { %s679_s17 = scalar_lea.hbm %s966_s6, 2048 }
  0x6b   :  { %p680_p6 = scmp.ne.s32.totalorder %s966_s6, %s679_s17  ;;  %p683_p7 = scmp.lt.u32.totalorder %s679_s17, %s966_s6 }
  0x6d   :  { %p685_p8 = pnand %p683_p7, %p680_p6 }
  0x6f   :  { %688 = shalt.err (!%p685_p8)
}
  0x70   :  { %s689_s3 = scalar_lea.vmem %s89_s29, 2048  ;;  %p694_p10 = scmp.lt.s32.totalorder %s89_s29, %s89_s29 }
  0x71   :  { %p690_p9 = scmp.ne.s32.totalorder %s89_s29, %s689_s3  ;;  %p695_p11 = scmp.lt.s32.totalorder %s689_s3, %s689_s3 }
  0x73   :  { %p696_p12 = por %p695_p11, %p694_p10 }
  0x75   :  { %p697_p13 = pnand %p696_p12, %p690_p9 }
  0x77   :  { %700 = shalt.err (!%p697_p13)
}
  0x78   :  { %94 = dma.hbm_to_vmem [thread:$0]  %s966_s6, 2048, %s89_s29, [#allocation14], %s758_s15, %s758_s15, %s759_s16  }
  0x79   :  { %s766_s20 = smov [#allocation16]   ;;  %s701_s30 = scalar_lea.hbm %s967_s7, 16 }
  0x7a   :  { %s101_s24 = sshll.u32 %s766_s20, 4  ;;  %p702_p0 = scmp.ne.s32.totalorder %s967_s7, %s701_s30  ;;  %s102_s24 = int_to_ptr.vmem [resolvable:$true] %s101_s24 }
  0x7b   :  { %p705_p1 = scmp.lt.u32.totalorder %s701_s30, %s967_s7 }
  0x7d   :  { %p707_p2 = pnand %p705_p1, %p702_p0 }
  0x7f   :  { %710 = shalt.err (!%p707_p2)
}
  0x80   :  { %s711_s11 = scalar_lea.vmem %s102_s24, 16  ;;  %s715_s6 = scalar_lea.vmem %s102_s24, 32 }
  0x81   :  { %p712_p3 = scmp.ne.s32.totalorder %s102_s24, %s711_s11  ;;  %p716_p4 = scmp.lt.s32.totalorder %s102_s24, %s102_s24 }
  0x82   :  { %p717_p5 = scmp.lt.s32.totalorder %s715_s6, %s711_s11 }
  0x84   :  { %p718_p6 = por %p717_p5, %p716_p4 }
  0x86   :  { %p719_p7 = pnand %p718_p6, %p712_p3 }
  0x88   :  { %722 = shalt.err (!%p719_p7)
}
  0x89   :  { %104 = dma.hbm_to_vmem [thread:$0]  %s967_s7, 16, %s102_s24, [#allocation17]  }
  0x8a   :  { %745 = dma.done.wait [#allocation5], 128  }
  0x8b   :  { %746 = vsyncadd [#allocation5], 4294967168 }
  0x8c   :  { %747 = dma.done.wait [#allocation8], 4096  }
  0x8d   :  { %748 = vsyncadd [#allocation8], 4294963200 }
  0x8e   :  { %749 = dma.done.wait [#allocation11], 32  }
  0x8f   :  { %750 = vsyncadd [#allocation11], 4294967264 }
  0x90   :  { %751 = dma.done.wait [#allocation14], 2064  }
  0x91   :  { %752 = vsyncadd [#allocation14], 4294965232 }
  0x92   :  { %753 = dma.done.wait [#allocation17], 16  }
  0x93   :  { %754 = vsyncadd [#allocation17], 4294967280  ;;  %v767_v0 = vmov 0   ;;  %v135_v1 = vld [vmem:[#allocation15 + $0x10] sm:$0xff]  ;;  %v133_v2 = vld [vmem:[#allocation15] sm:$0xff]  ;;  %v768_v9 = vmov 0.0|0.0  }
  0x94   :  { %546 = vset.pattern.permute.xlu1 %v767_v0  ;;  %545 = vset.pattern.permute.xlu0 %v767_v0  ;;  %v136_v3 = vld [vmem:[#allocation15 + $0x18] sm:$0xff]  ;;  %v134_v4 = vld [vmem:[#allocation15 + $0x8] sm:$0xff]  ;;  %v137_v6 = vld [vmem:[#allocation15 + $0x20] sm:$0xff]  ;;  %vm769_vm0 = vmmov 0   ;;  %v770_v18 = vmov 0.0   ;;  %s771_s7 = smov [#allocation18]  }
  0x95   :  { %162 = vperm.xlu1 %546, %v135_v1   ;;  %152 = vperm.xlu0 %545, %v133_v2   ;;  %v138_v5 = vld [vmem:[#allocation15 + $0x28] sm:$0xff]  ;;  %v140_v7 = vld [vmem:[#allocation15 + $0x38] sm:$0xff]  ;;  %v139_v8 = vld [vmem:[#allocation15 + $0x30] sm:$0xff]  ;;  %s439_s29 = sshll.u32 %s771_s7, 4  ;;  %s440_s29 = int_to_ptr.vmem [resolvable:$true] %s439_s29 }
  0x96   :  { %506 = vmatprep.subr.bf16.mxu0 %v768_v9  ;;  %v142_v10 = vld [vmem:[#allocation15 + $0x48] sm:$0xff]  ;;  %v141_v11 = vld [vmem:[#allocation15 + $0x40] sm:$0xff]  ;;  %v144_v12 = vld [vmem:[#allocation15 + $0x58] sm:$0xff]  ;;  %503 = vmatprep.mubr.msk.f32.mxu0 %vm769_vm0, %v770_v18  ;;  %s723_s5 = scalar_lea.vmem %s440_s29, 128  ;;  %p728_p9 = scmp.lt.s32.totalorder %s440_s29, %s440_s29 }
  0x97   :  { %v143_v13 = vld [vmem:[#allocation15 + $0x50] sm:$0xff]  ;;  %v146_v14 = vld [vmem:[#allocation15 + $0x68] sm:$0xff]  ;;  %v145_v15 = vld [vmem:[#allocation15 + $0x60] sm:$0xff]  ;;  %p724_p8 = scmp.ne.s32.totalorder %s440_s29, %s723_s5  ;;  %p729_p10 = scmp.lt.s32.totalorder %s723_s5, %s723_s5 }
  0x98   :  { %v148_v16 = vld [vmem:[#allocation15 + $0x78] sm:$0xff]  ;;  %v147_v17 = vld [vmem:[#allocation15 + $0x70] sm:$0xff]  ;;  %v334_v21 = vld [vmem:[#allocation16] sm:$0x1] }
  0x99   :  { %167 = vperm.xlu1 %546, %v136_v3   ;;  %157 = vperm.xlu0 %545, %v134_v4   ;;  %v332_v19 = vld [vmem:[#allocation10] sm:$0x1]  ;;  %v333_v20 = vld [vmem:[#allocation12] sm:$0x1]  ;;  %v923_v24 = vld [vmem:[#allocation13] ss:$0 sm:$0xff]  ;;  %p730_p11 = por %p729_p10, %p728_p9 }
  0x9a   :  { %v335_v22 = vmul.f32 %v334_v21, %v333_v20  ;;  %v268_v28 = vld [vmem:[#allocation9] sm:$0xff]  ;;  %v269_v29 = vld [vmem:[#allocation9 + $0x8] sm:$0xff]  ;;  %v270_v39 = vld [vmem:[#allocation9 + $0x10] sm:$0xff] }
  0x9b   :  { %v252_v34 = vld [vmem:[#allocation7] sm:$0xff]  ;;  %v253_v35 = vld [vmem:[#allocation7 + $0x8] sm:$0xff]  ;;  %v271_v40 = vld [vmem:[#allocation9 + $0x18] sm:$0xff]  ;;  %p731_p12 = pnand %p730_p11, %p724_p8 }
  0x9c   :  { %v336_v23 = vadd.f32 %v335_v22, %v332_v19  ;;  %v254_v46 = vld [vmem:[#allocation7 + $0x10] sm:$0xff]  ;;  %v255_v47 = vld [vmem:[#allocation7 + $0x18] sm:$0xff]  ;;  %v273_v54 = vld [vmem:[#allocation9 + $0x28] sm:$0xff] }
  0x9d   :  { %177 = vperm.xlu1 %546, %v138_v5   ;;  %172 = vperm.xlu0 %545, %v137_v6   ;;  %v272_v55 = vld [vmem:[#allocation9 + $0x20] sm:$0xff]  ;;  %v257_v59 = vld [vmem:[#allocation7 + $0x28] sm:$0xff]  ;;  %v275_v3 = vld [vmem:[#allocation9 + $0x38] sm:$0xff] }
  0x9e   :  { %337 = vst [vmem:[#allocation3] sm:$0x1] %v336_v23  ;;  %v256_v60 = vld [vmem:[#allocation7 + $0x20] sm:$0xff]  ;;  %v274_v4 = vld [vmem:[#allocation9 + $0x30] sm:$0xff]  ;;  %v261_v22 = vld [vmem:[#allocation7 + $0x48] sm:$0xff] }
  0x9f   :  { %v276_v18 = vld [vmem:[#allocation9 + $0x40] sm:$0xff] }
  0xa0   :  { %v260_v23 = vld [vmem:[#allocation7 + $0x40] sm:$0xff] }
  0xa1   :  { %187 = vperm.xlu1 %546, %v140_v7   ;;  %182 = vperm.xlu0 %545, %v139_v8   ;;  %v259_v8 = vld [vmem:[#allocation7 + $0x38] sm:$0xff] }
  0xa5   :  { %197 = vperm.xlu1 %546, %v142_v10   ;;  %192 = vperm.xlu0 %545, %v141_v11   ;;  %v258_v10 = vld [vmem:[#allocation7 + $0x30] sm:$0xff] }
  0xa9   :  { %207 = vperm.xlu1 %546, %v144_v12   ;;  %202 = vperm.xlu0 %545, %v143_v13  }
  0xad   :  { %217 = vperm.xlu1 %546, %v146_v14   ;;  %212 = vperm.xlu0 %545, %v145_v15  }
  0xb1   :  { %227 = vperm.xlu1 %546, %v148_v16   ;;  %222 = vperm.xlu0 %545, %v147_v17   ;;  %v277_v17 = vld [vmem:[#allocation9 + $0x48] sm:$0xff] }
 0x114   :  { %v163_v25 = vpop.permute.xlu1 %162  ;;  %v153_v26 = vpop.permute.xlu0 %152 }
 0x115   :  { %v236_v27 = vmul.f32 %v923_v24, %v153_v26  ;;  %v238_v36 = vmul.f32 %v923_v24, %v163_v25 }
 0x117   :  { %v284_v31 = vmul.f32 %v268_v28, %v236_v27  ;;  %v286_v43 = vmul.f32 %v270_v39, %v238_v36  ;;  %v263_v36 = vld [vmem:[#allocation7 + $0x58] sm:$0xff] }
 0x118   :  { %v158_v30 = vpop.permute.xlu0 %157  ;;  %v168_v33 = vpop.permute.xlu1 %167 }
 0x119   :  { %v237_v32 = vmul.f32 %v923_v24, %v158_v30  ;;  %v239_v37 = vmul.f32 %v923_v24, %v168_v33  ;;  %v300_v41 = vadd.f32 %v284_v31, %v252_v34  ;;  %v302_v50 = vadd.f32 %v286_v43, %v254_v46  ;;  %v279_v31 = vld [vmem:[#allocation9 + $0x58] sm:$0xff] }
 0x11b   :  { %v285_v38 = vmul.f32 %v269_v29, %v237_v32  ;;  %v287_v44 = vmul.f32 %v271_v40, %v239_v37  ;;  %v278_v32 = vld [vmem:[#allocation9 + $0x50] sm:$0xff] }
 0x11c   :  { %v178_v48 = vpop.permute.xlu1 %177  ;;  %v173_v49 = vpop.permute.xlu0 %172  ;;  %v262_v37 = vld [vmem:[#allocation7 + $0x50] sm:$0xff] }
 0x11d   :  { %v301_v42 = vadd.f32 %v285_v38, %v253_v35  ;;  %v303_v51 = vadd.f32 %v287_v44, %v255_v47  ;;  %v241_v52 = vmul.f32 %v923_v24, %v178_v48  ;;  %v240_v53 = vmul.f32 %v923_v24, %v173_v49  ;;  %v281_v44 = vld [vmem:[#allocation9 + $0x68] sm:$0xff] }
 0x11e   :  { %v265_v49 = vld [vmem:[#allocation7 + $0x68] sm:$0xff] }
 0x11f   :  { %v507_v45 = vpack.c.bf16 %v301_v42, %v300_v41  ;;  %v289_v56 = vmul.f32 %v273_v54, %v241_v52  ;;  %v288_v57 = vmul.f32 %v272_v55, %v240_v53  ;;  %v510_v58 = vpack.c.bf16 %v303_v51, %v302_v50  ;;  %v264_v50 = vld [vmem:[#allocation7 + $0x60] sm:$0xff] }
 0x120   :  { %v188_v61 = vpop.permute.xlu1 %187  ;;  %v183_v62 = vpop.permute.xlu0 %182 }
 0x121   :  { %508 = vmatpush3.bf16.xpose.msra.mxu0 %v507_v45  ;;  %v305_v63 = vadd.f32 %v289_v56, %v257_v59  ;;  %v304_v0 = vadd.f32 %v288_v57, %v256_v60  ;;  %v243_v1 = vmul.f32 %v923_v24, %v188_v61  ;;  %v242_v2 = vmul.f32 %v923_v24, %v183_v62  ;;  %v280_v45 = vld [vmem:[#allocation9 + $0x60] sm:$0xff]  ;;  %v283_v57 = vld [vmem:[#allocation9 + $0x78] sm:$0xff] }
 0x122   :  { %509 = vmatprep.subr.bf16.mxu0 %v768_v9  ;;  %v267_v62 = vld [vmem:[#allocation7 + $0x78] sm:$0xff] }
 0x123   :  { %v291_v5 = vmul.f32 %v275_v3, %v243_v1  ;;  %v290_v6 = vmul.f32 %v274_v4, %v242_v2  ;;  %v513_v7 = vpack.c.bf16 %v305_v63, %v304_v0  ;;  %v266_v63 = vld [vmem:[#allocation7 + $0x70] sm:$0xff]  ;;  %v338_v3 = vld [vmem:[#allocation4] sm:$0xff] }
 0x124   :  { %v198_v11 = vpop.permute.xlu1 %197  ;;  %v193_v12 = vpop.permute.xlu0 %192  ;;  %v453_v4 = vld [vmem:[#allocation3] ss:$0 sm:$0xff] }
 0x125   :  { %v307_v13 = vadd.f32 %v291_v5, %v259_v8  ;;  %v306_v14 = vadd.f32 %v290_v6, %v258_v10  ;;  %v245_v15 = vmul.f32 %v923_v24, %v198_v11  ;;  %v244_v16 = vmul.f32 %v923_v24, %v193_v12 }
 0x127   :  { %v293_v19 = vmul.f32 %v277_v17, %v245_v15  ;;  %v292_v20 = vmul.f32 %v276_v18, %v244_v16  ;;  %v516_v21 = vpack.c.bf16 %v307_v13, %v306_v14 }
 0x128   :  { %v208_v25 = vpop.permute.xlu1 %207  ;;  %v203_v26 = vpop.permute.xlu0 %202 }
 0x129   :  { %511 = vmatpush3.bf16.xpose.msra.mxu0 %v510_v58  ;;  %v309_v27 = vadd.f32 %v293_v19, %v261_v22  ;;  %v308_v28 = vadd.f32 %v292_v20, %v260_v23  ;;  %v247_v29 = vmul.f32 %v923_v24, %v208_v25  ;;  %v246_v30 = vmul.f32 %v923_v24, %v203_v26  ;;  %v282_v58 = vld [vmem:[#allocation9 + $0x70] sm:$0xff] }
 0x12a   :  { %512 = vmatprep.subr.bf16.mxu0 %v768_v9 }
 0x12b   :  { %v295_v33 = vmul.f32 %v279_v31, %v247_v29  ;;  %v294_v34 = vmul.f32 %v278_v32, %v246_v30  ;;  %v519_v35 = vpack.c.bf16 %v309_v27, %v308_v28 }
 0x12c   :  { %v218_v38 = vpop.permute.xlu1 %217  ;;  %v213_v39 = vpop.permute.xlu0 %212 }
 0x12d   :  { %v311_v40 = vadd.f32 %v295_v33, %v263_v36  ;;  %v310_v41 = vadd.f32 %v294_v34, %v262_v37  ;;  %v249_v42 = vmul.f32 %v923_v24, %v218_v38  ;;  %v248_v43 = vmul.f32 %v923_v24, %v213_v39 }
 0x12f   :  { %v297_v46 = vmul.f32 %v281_v44, %v249_v42  ;;  %v296_v47 = vmul.f32 %v280_v45, %v248_v43  ;;  %v522_v48 = vpack.c.bf16 %v311_v40, %v310_v41 }
 0x130   :  { %v228_v51 = vpop.permute.xlu1 %227  ;;  %v223_v52 = vpop.permute.xlu0 %222 }
 0x131   :  { %514 = vmatpush3.bf16.xpose.msra.mxu0 %v513_v7  ;;  %v313_v53 = vadd.f32 %v297_v46, %v265_v49  ;;  %v312_v54 = vadd.f32 %v296_v47, %v264_v50  ;;  %v251_v55 = vmul.f32 %v923_v24, %v228_v51  ;;  %v250_v56 = vmul.f32 %v923_v24, %v223_v52 }
 0x132   :  { %515 = vmatprep.subr.bf16.mxu0 %v768_v9 }
 0x133   :  { %v299_v59 = vmul.f32 %v283_v57, %v251_v55  ;;  %v298_v60 = vmul.f32 %v282_v58, %v250_v56  ;;  %v525_v61 = vpack.c.bf16 %v313_v53, %v312_v54 }
 0x135   :  { %v315_v0 = vadd.f32 %v299_v59, %v267_v62  ;;  %v314_v1 = vadd.f32 %v298_v60, %v266_v63 }
 0x137   :  { %v528_v2 = vpack.c.bf16 %v315_v0, %v314_v1 }
 0x139   :  { %517 = vmatpush3.bf16.xpose.msra.mxu0 %v516_v21 }
 0x13a   :  { %518 = vmatprep.subr.bf16.mxu0 %v768_v9 }
 0x141   :  { %520 = vmatpush3.bf16.xpose.msra.mxu0 %v519_v35 }
 0x142   :  { %521 = vmatprep.subr.bf16.mxu0 %v768_v9 }
 0x149   :  { %523 = vmatpush3.bf16.xpose.msra.mxu0 %v522_v48 }
 0x14a   :  { %524 = vmatprep.subr.bf16.mxu0 %v768_v9 }
 0x151   :  { %526 = vmatpush3.bf16.xpose.msra.mxu0 %v525_v61 }
 0x152   :  { %527 = vmatprep.subr.bf16.mxu0 %v768_v9 }
 0x159   :  { %529 = vmatpush3.bf16.xpose.msra.mxu0 %v528_v2 }
 0x160   :  { %504 = vmatmul.mubr.f32.vlgmr.msra.gmra.mrb[0].mxu0 %v338_v3 }
 0x233   :  { %v428_v24 = vpop.f32.mrb[0].mxu0 }
 0x234   :  { %v429_v5 = vadd.f32 %v453_v4, %v428_v24  ;;  %v505_v6 = vpop.f32.mrb[1].mxu0 }
 0x236   :  { %432 = vst [vmem:[#allocation18] sm:$0xff] %v429_v5 }
 0x237   :  { %734 = shalt.err (!%p731_p12)
}
 0x238   :  { %s735_s22 = scalar_lea.hbm %s968_s8, 128 }
 0x239   :  { %p736_p13 = scmp.ne.s32.totalorder %s968_s8, %s735_s22  ;;  %p739_p0 = scmp.lt.u32.totalorder %s735_s22, %s968_s8 }
 0x23b   :  { %p741_p1 = pnand %p739_p0, %p736_p13 }
 0x23d   :  { %744 = shalt.err (!%p741_p1)
}
 0x23e   :  { %442 = dma.vmem_to_hbm [thread:$0]  %s440_s29, 128, %s968_s8, [#allocation6]  }
 0x23f   :  { %755 = dma.done.wait [#allocation6], 128  }
 0x240   :  { %756 = vsyncadd [#allocation6], 4294967168 }
 0x241   :  { %446 = vsyncpa [#allocation5], 1 }
 0x242   :  { %447 = vsyncpa [#allocation8], 1 }
 0x243   :  { %448 = vsyncpa [#allocation11], 1 }
 0x244   :  { %449 = vsyncpa [#allocation14], 1 }
 0x245   :  { %450 = vsyncpa [#allocation17], 1 }
 0x246   :  { %451 = vsyncpa [#allocation6], 1 }

</bundles_post_ra>
